<compile_context>
chip_gen: v7x
topology: tpu7x:2x2x1
jax: 0.10.0
libtpu: 0.0.40
codegen_flags: <defaults>
</compile_context>

<pallas_src>
import functools

import jax
import jax.numpy as jnp
from jax.experimental import pallas as pl
from jax.experimental.pallas import tpu as pltpu


def _round_up(n, m):
    return (n + m - 1) // m * m


def _largest_divisor_leq(n, cap):
    cap = max(1, min(n, cap))
    for d in range(cap, 0, -1):
        if n % d == 0:
            return d
    return 1


def _vmem_config():
    """(x_tile_budget_bytes, vmem_limit_bytes), generation aware."""
    try:
        cap = int(pltpu.get_tpu_info().vmem_capacity_bytes)
    except Exception:
        cap = 128 * 1024 * 1024
    if cap >= 100 * 1024 * 1024:        # v5e / v6e: 128 MiB physical VMEM
        return 12 * 1024 * 1024, 64 * 1024 * 1024
    return 8 * 1024 * 1024, 48 * 1024 * 1024   # v7x: 64 MiB physical VMEM


def _choose_tiling(B, C, S, itemsize, x_tile_budget):
    """Returns (Bt, TS, num_s_tiles, need_mask).

    If a whole per-image (C, S) slab fits in the budget, keep TS = S (full extent,
    no masking) and batch Bt images per grid step to amortize per-step overhead.
    Otherwise tile S in 128-aligned chunks (>=512 lanes for DMA segment length)
    and mask the ragged tail inside the kernel.
    """
    per_image = C * S * itemsize
    if per_image <= x_tile_budget:
        bt_cap = max(1, x_tile_budget // max(1, per_image))
        Bt = _largest_divisor_leq(B, min(bt_cap, 8))   # cap unroll depth
        return Bt, S, 1, False
    max_ts = max(128, (x_tile_budget // (C * itemsize)) // 128 * 128)
    TS = min(max(512, max_ts), _round_up(S, 128))
    num_s = (S + TS - 1) // TS
    return 1, TS, num_s, (num_s * TS != S)


def csra_kernel(x_ref, w_ref, o_ref, m_sc, l_sc, num_sc, sum_sc,
                *, T, lam, S_total, need_mask):
    # x_ref  : (Bt, C, TS)      activation tile, channels on sublanes, spatial on lanes
    # w_ref  : (NC_pad, C)      L2-normalized 1x1 conv weights (pad rows are zero)
    # o_ref  : (Bt, NC_pad, 1)
    # scratch: (Bt, NC_pad, 1) f32 running accumulators, persist across the S grid axis
    s_idx = pl.program_id(1)
    n_s = pl.num_programs(1)
    Bt = x_ref.shape[0]
    TS = x_ref.shape[-1]

    @pl.when(s_idx == 0)
    def _init():
        m_sc[...] = jnp.full_like(m_sc, -jnp.inf)
        l_sc[...] = jnp.zeros_like(l_sc)
        num_sc[...] = jnp.zeros_like(num_sc)
        sum_sc[...] = jnp.zeros_like(sum_sc)

    w = w_ref[...]                                    # (NC_pad, C)

    if need_mask:
        lane = jax.lax.broadcasted_iota(jnp.int32, (1, TS), 1)
        valid = (lane + s_idx * TS) < S_total          # (1, TS) bool
    neg_inf = jnp.float32(-jnp.inf)

    # Static unrolled loop over the Bt images in this block.
    for b in range(Bt):
        x = x_ref[b]                                   # (C, TS)
        # 1x1 conv == MXU matmul contracting C: (NC_pad, C) x (C, TS) -> (NC_pad, TS)
        score = jnp.dot(w, x, preferred_element_type=jnp.float32)
        if need_mask:
            # Zero invalid lanes so sum and score*e contributions vanish and any
            # garbage (NaN/Inf) from the out-of-bounds tail cannot leak.
            score = jnp.where(valid, score, 0.0)

        # running spatial sum (base logit = mean over spatial, divided by true S later)
        sum_sc[b] += jnp.sum(score, axis=-1, keepdims=True)

        if T == 99:
            sm = jnp.where(valid, score, neg_inf) if need_mask else score
            m_sc[b] = jnp.maximum(m_sc[b], jnp.max(sm, axis=-1, keepdims=True))
        else:
            # Online softmax: running max m, denominator l = sum(e),
            # numerator num = sum(score * e); softmax never materialized.
            st = score * T
            if need_mask:
                st = jnp.where(valid, st, neg_inf)
            m_prev = m_sc[b]
            m_new = jnp.maximum(m_prev, jnp.max(st, axis=-1, keepdims=True))
            alpha = jnp.exp(m_prev - m_new)
            e = jnp.exp(st - m_new)
            l_sc[b] = alpha * l_sc[b] + jnp.sum(e, axis=-1, keepdims=True)
            num_sc[b] = alpha * num_sc[b] + jnp.sum(score * e, axis=-1, keepdims=True)
            m_sc[b] = m_new

    @pl.when(s_idx == n_s - 1)
    def _finalize():
        inv_s = jnp.float32(1.0 / S_total)
        for b in range(Bt):
            base = sum_sc[b] * inv_s                   # (NC_pad, 1)
            if T == 99:
                att = m_sc[b]
            else:
                att = num_sc[b] * pl.reciprocal(l_sc[b], approx=False)
            o_ref[b] = (base + lam * att).astype(o_ref.dtype)


def csra_forward(x_nchw, weight, *, T, lam, x_tile_budget_bytes=None):
    """x_nchw: (B, C, H, W), weight: (NC, C, 1, 1). Returns (B, NC) float32.

    x_nchw may be bf16 (recommended for memory-bound backbones); weights are folded
    with their per-class L2 norm and cast to x's dtype so the MXU runs natively.
    """
    B, C, H, W = x_nchw.shape
    NC = weight.shape[0]
    S = H * W

    # (B, C, H, W) -> (B, C, S): contiguous, metadata-only reshape (no HBM pass).
    x_bcs = x_nchw.reshape(B, C, S)

    # Fold per-class L2 norm into the weights (tiny NC x C work, done once).
    # NOTE: matches PyTorch -- an all-zero class row still yields inf/NaN.
    w2d = weight.reshape(NC, C).astype(jnp.float32)
    norm = jnp.sqrt(jnp.sum(w2d * w2d, axis=1, keepdims=True))
    w_hat = (w2d / norm).astype(x_nchw.dtype)

    # Pad classes to a sublane multiple; pad rows are zero and sliced off below.
    NC_pad = _round_up(NC, 8)
    if NC_pad != NC:
        w_hat = jnp.pad(w_hat, ((0, NC_pad - NC), (0, 0)))

    itemsize = jnp.dtype(x_nchw.dtype).itemsize
    default_budget, vmem_limit = _vmem_config()
    budget = default_budget if x_tile_budget_bytes is None else x_tile_budget_bytes
    Bt, TS, n_s, need_mask = _choose_tiling(B, C, S, itemsize, budget)

    grid = (B // Bt, n_s)
    kernel = functools.partial(csra_kernel, T=T, lam=lam, S_total=S,
                               need_mask=need_mask)

    out = pl.pallas_call(
        kernel,
        out_shape=jax.ShapeDtypeStruct((B, NC_pad, 1), jnp.float32),
        grid_spec=pltpu.PrefetchScalarGridSpec(
            num_scalar_prefetch=0,
            grid=grid,
            in_specs=[
                pl.BlockSpec((Bt, C, TS), lambda b, s: (b, 0, s)),
                pl.BlockSpec((NC_pad, C), lambda b, s: (0, 0)),
            ],
            out_specs=pl.BlockSpec((Bt, NC_pad, 1), lambda b, s: (b, 0, 0)),
            scratch_shapes=[pltpu.VMEM((Bt, NC_pad, 1), jnp.float32)] * 4,
        ),
        compiler_params=pltpu.CompilerParams(
            dimension_semantics=("parallel", "arbitrary"),
            vmem_limit_bytes=vmem_limit,
        ),
    )(x_bcs, w_hat)
    return out[:, :NC, 0]


def csra_reference(x_nchw, weight, *, T, lam):
    """Pure-JAX reference matching the PyTorch forward exactly."""
    B, C, H, W = x_nchw.shape
    NC = weight.shape[0]
    w2d = weight.reshape(NC, C).astype(jnp.float32)
    x = x_nchw.astype(jnp.float32)
    score = jnp.einsum("bchw,nc->bnhw", x, w2d)
    norm = jnp.linalg.norm(w2d, axis=1)                          # (NC,)
    score = score / norm[None, :, None, None]
    score = score.reshape(B, NC, H * W)
    base_logit = jnp.mean(score, axis=2)
    if T == 99:
        att_logit = jnp.max(score, axis=2)
    else:
        soft = jax.nn.softmax(score * T, axis=2)
        att_logit = jnp.sum(score * soft, axis=2)
    return base_logit + lam * att_logit


if __name__ == "__main__":
    key = jax.random.PRNGKey(0)
    kx, kw, kx2, kw2 = jax.random.split(key, 4)

    # --- Test 1: small shapes, batched-images path (Bt=2, single S tile) ------------
    B, C, H, W = 2, 4, 16, 16
    NUM_CLASSES = 8
    LAM = 0.1
    x = jax.random.normal(kx, (B, C, H, W), dtype=jnp.float32)
    weight = jax.random.normal(kw, (NUM_CLASSES, C, 1, 1), dtype=jnp.float32) * 0.1

    out = jax.block_until_ready(csra_forward(x, weight, T=1, lam=LAM))
    ref = csra_reference(x, weight, T=1, lam=LAM)
    assert out.shape == (B, NUM_CLASSES)
    assert jnp.allclose(out, ref, rtol=1e-5, atol=1e-5), (out, ref)

    out99 = jax.block_until_ready(csra_forward(x, weight, T=99, lam=LAM))
    ref99 = csra_reference(x, weight, T=99, lam=LAM)
    assert jnp.allclose(out99, ref99, rtol=1e-5, atol=1e-5), (out99, ref99)

    # --- Test 2: ragged-S tiled path (S=576 not 128-aligned, forced small tile budget,
    #             NC padded 10 -> 16) exercises the masked online reduction -----------
    B2, C2, H2, W2 = 2, 8, 24, 24
    NC2 = 10
    x2 = jax.random.normal(kx2, (B2, C2, H2, W2), dtype=jnp.float32)
    weight2 = jax.random.normal(kw2, (NC2, C2, 1, 1), dtype=jnp.float32) * 0.1

    out2 = jax.block_until_ready(
        csra_forward(x2, weight2, T=2, lam=0.3, x_tile_budget_bytes=8192))
    ref2 = csra_reference(x2, weight2, T=2, lam=0.3)
    assert out2.shape == (B2, NC2)
    assert jnp.allclose(out2, ref2, rtol=1e-5, atol=1e-5), (out2, ref2)

    out2m = jax.block_until_ready(
        csra_forward(x2, weight2, T=99, lam=0.3, x_tile_budget_bytes=8192))
    ref2m = csra_reference(x2, weight2, T=99, lam=0.3)
    assert jnp.allclose(out2m, ref2m, rtol=1e-5, atol=1e-5), (out2m, ref2m)

    print("KERNEL_OK")
</pallas_src>

<mosaic_0001>
module attributes {stable_mosaic.version = 11 : i64} {
  func.func @csra_kernel(%arg0: i32, %arg1: i32, %arg2: memref<2x4x256xf32, #tpu.memory_space<vmem>>, %arg3: memref<8x4xf32, #tpu.memory_space<vmem>>, %arg4: memref<2x8x1xf32, #tpu.memory_space<vmem>>, %arg5: memref<2x8x1xf32, #tpu.memory_space<vmem>>, %arg6: memref<2x8x1xf32, #tpu.memory_space<vmem>>, %arg7: memref<2x8x1xf32, #tpu.memory_space<vmem>>, %arg8: memref<2x8x1xf32, #tpu.memory_space<vmem>>) attributes {dimension_semantics = [#tpu.dimension_semantics<parallel>, #tpu.dimension_semantics<arbitrary>], iteration_bounds = array<i64: 1, 1>, scalar_prefetch = 0 : i64, scratch_operands = 4 : i64, tpu.core_type = #tpu.core_type<tc>, window_params = [{transform_indices = @transform_0, window_bounds = array<i64: 2, 4, 256>}, {pipeline_mode = #tpu.pipeline_mode<synchronous>, transform_indices = @transform_1, window_bounds = array<i64: 8, 4>}, {transform_indices = @transform_2, window_bounds = array<i64: 2, 8, 1>}]} {
    %c0_i32 = arith.constant 0 : i32
    %0 = arith.cmpi eq, %arg1, %c0_i32 : i32
    %1 = arith.extui %0 : i1 to i32
    %c0_i32_0 = arith.constant 0 : i32
    %2 = arith.cmpi ne, %1, %c0_i32_0 : i32
    scf.if %2 {
      %cst_68 = arith.constant 0xFF800000 : f32
      %97 = vector.broadcast %cst_68 : f32 to vector<2x8x1xf32>
      %c0_69 = arith.constant 0 : index
      %c0_70 = arith.constant 0 : index
      %c0_71 = arith.constant 0 : index
      %98 = vector.load %arg5[%c0_69, %c0_70, %c0_71] : memref<2x8x1xf32, #tpu.memory_space<vmem>>, vector<2x8x1xf32>
      tpu.vector_store %arg5[%c0_69, %c0_70, %c0_71], %97 {strides = array<i32>} : memref<2x8x1xf32, #tpu.memory_space<vmem>>, vector<2x8x1xf32>,
      %cst_72 = arith.constant 0.000000e+00 : f32
      %99 = vector.broadcast %cst_72 : f32 to vector<2x8x1xf32>
      %c0_73 = arith.constant 0 : index
      %c0_74 = arith.constant 0 : index
      %c0_75 = arith.constant 0 : index
      %100 = vector.load %arg6[%c0_73, %c0_74, %c0_75] : memref<2x8x1xf32, #tpu.memory_space<vmem>>, vector<2x8x1xf32>
      tpu.vector_store %arg6[%c0_73, %c0_74, %c0_75], %99 {strides = array<i32>} : memref<2x8x1xf32, #tpu.memory_space<vmem>>, vector<2x8x1xf32>,
      %cst_76 = arith.constant 0.000000e+00 : f32
      %101 = vector.broadcast %cst_76 : f32 to vector<2x8x1xf32>
      %c0_77 = arith.constant 0 : index
      %c0_78 = arith.constant 0 : index
      %c0_79 = arith.constant 0 : index
      %102 = vector.load %arg7[%c0_77, %c0_78, %c0_79] : memref<2x8x1xf32, #tpu.memory_space<vmem>>, vector<2x8x1xf32>
      tpu.vector_store %arg7[%c0_77, %c0_78, %c0_79], %101 {strides = array<i32>} : memref<2x8x1xf32, #tpu.memory_space<vmem>>, vector<2x8x1xf32>,
      %cst_80 = arith.constant 0.000000e+00 : f32
      %103 = vector.broadcast %cst_80 : f32 to vector<2x8x1xf32>
      %c0_81 = arith.constant 0 : index
      %c0_82 = arith.constant 0 : index
      %c0_83 = arith.constant 0 : index
      %104 = vector.load %arg8[%c0_81, %c0_82, %c0_83] : memref<2x8x1xf32, #tpu.memory_space<vmem>>, vector<2x8x1xf32>
      tpu.vector_store %arg8[%c0_81, %c0_82, %c0_83], %103 {strides = array<i32>} : memref<2x8x1xf32, #tpu.memory_space<vmem>>, vector<2x8x1xf32>,
    } else {
    }
    %c0 = arith.constant 0 : index
    %c0_1 = arith.constant 0 : index
    %3 = vector.load %arg3[%c0, %c0_1] : memref<8x4xf32, #tpu.memory_space<vmem>>, vector<8x4xf32>
    %c0_2 = arith.constant 0 : index
    %c0_3 = arith.constant 0 : index
    %c0_4 = arith.constant 0 : index
    %4 = vector.load %arg2[%c0_2, %c0_3, %c0_4] : memref<2x4x256xf32, #tpu.memory_space<vmem>>, vector<1x4x256xf32>
    %5 = vector.shape_cast %4 : vector<1x4x256xf32> to vector<4x256xf32>
    %cst = arith.constant dense<0.000000e+00> : vector<8x256xf32>
    %6 = tpu.matmul %3, %5, %cst {dimension_numbers = #tpu.dot_dimension_numbers<[1], [0], [0], [1], [0, 0, 1, 1], [], []>} : vector<8x4xf32>, vector<4x256xf32>, vector<8x256xf32> -> vector<8x256xf32>
    %c0_5 = arith.constant 0 : index
    %c0_6 = arith.constant 0 : index
    %c0_7 = arith.constant 0 : index
    %7 = vector.load %arg8[%c0_5, %c0_6, %c0_7] : memref<2x8x1xf32, #tpu.memory_space<vmem>>, vector<1x8x1xf32>
    %8 = vector.shape_cast %7 : vector<1x8x1xf32> to vector<8x1xf32>
    %cst_8 = arith.constant dense<0.000000e+00> : vector<8xf32>
    %9 = vector.multi_reduction <add>, %6, %cst_8 [1] : vector<8x256xf32> to vector<8xf32>
    %10 = vector.shape_cast %9 : vector<8xf32> to vector<8x1xf32>
    %11 = arith.addf %8, %10 : vector<8x1xf32>
    %c0_9 = arith.constant 0 : index
    %c0_10 = arith.constant 0 : index
    %c0_11 = arith.constant 0 : index
    %12 = vector.load %arg8[%c0_9, %c0_10, %c0_11] : memref<2x8x1xf32, #tpu.memory_space<vmem>>, vector<1x8x1xf32>
    %13 = vector.shape_cast %12 : vector<1x8x1xf32> to vector<8x1xf32>
    %14 = vector.shape_cast %11 : vector<8x1xf32> to vector<1x8x1xf32>
    tpu.vector_store %arg8[%c0_9, %c0_10, %c0_11], %14 {strides = array<i32>} : memref<2x8x1xf32, #tpu.memory_space<vmem>>, vector<1x8x1xf32>,
    %cst_12 = arith.constant 1.000000e+00 : f32
    %15 = vector.broadcast %cst_12 : f32 to vector<8x256xf32>
    %16 = arith.mulf %6, %15 : vector<8x256xf32>
    %c0_13 = arith.constant 0 : index
    %c0_14 = arith.constant 0 : index
    %c0_15 = arith.constant 0 : index
    %17 = vector.load %arg5[%c0_13, %c0_14, %c0_15] : memref<2x8x1xf32, #tpu.memory_space<vmem>>, vector<1x8x1xf32>
    %18 = vector.shape_cast %17 : vector<1x8x1xf32> to vector<8x1xf32>
    %cst_16 = arith.constant dense<0xFF800000> : vector<8xf32>
    %19 = vector.multi_reduction <maximumf>, %16, %cst_16 [1] : vector<8x256xf32> to vector<8xf32>
    %20 = vector.shape_cast %19 : vector<8xf32> to vector<8x1xf32>
    %21 = arith.maximumf %18, %20 : vector<8x1xf32>
    %22 = arith.subf %18, %21 : vector<8x1xf32>
    %23 = math.exp %22 : vector<8x1xf32>
    %24 = vector.broadcast %21 : vector<8x1xf32> to vector<8x256xf32>
    %25 = arith.subf %16, %24 : vector<8x256xf32>
    %26 = math.exp %25 : vector<8x256xf32>
    %c0_17 = arith.constant 0 : index
    %c0_18 = arith.constant 0 : index
    %c0_19 = arith.constant 0 : index
    %27 = vector.load %arg6[%c0_17, %c0_18, %c0_19] : memref<2x8x1xf32, #tpu.memory_space<vmem>>, vector<1x8x1xf32>
    %28 = vector.shape_cast %27 : vector<1x8x1xf32> to vector<8x1xf32>
    %29 = arith.mulf %23, %28 : vector<8x1xf32>
    %cst_20 = arith.constant dense<0.000000e+00> : vector<8xf32>
    %30 = vector.multi_reduction <add>, %26, %cst_20 [1] : vector<8x256xf32> to vector<8xf32>
    %31 = vector.shape_cast %30 : vector<8xf32> to vector<8x1xf32>
    %32 = arith.addf %29, %31 : vector<8x1xf32>
    %c0_21 = arith.constant 0 : index
    %c0_22 = arith.constant 0 : index
    %c0_23 = arith.constant 0 : index
    %33 = vector.load %arg6[%c0_21, %c0_22, %c0_23] : memref<2x8x1xf32, #tpu.memory_space<vmem>>, vector<1x8x1xf32>
    %34 = vector.shape_cast %33 : vector<1x8x1xf32> to vector<8x1xf32>
    %35 = vector.shape_cast %32 : vector<8x1xf32> to vector<1x8x1xf32>
    tpu.vector_store %arg6[%c0_21, %c0_22, %c0_23], %35 {strides = array<i32>} : memref<2x8x1xf32, #tpu.memory_space<vmem>>, vector<1x8x1xf32>,
    %c0_24 = arith.constant 0 : index
    %c0_25 = arith.constant 0 : index
    %c0_26 = arith.constant 0 : index
    %36 = vector.load %arg7[%c0_24, %c0_25, %c0_26] : memref<2x8x1xf32, #tpu.memory_space<vmem>>, vector<1x8x1xf32>
    %37 = vector.shape_cast %36 : vector<1x8x1xf32> to vector<8x1xf32>
    %38 = arith.mulf %23, %37 : vector<8x1xf32>
    %39 = arith.mulf %6, %26 : vector<8x256xf32>
    %cst_27 = arith.constant dense<0.000000e+00> : vector<8xf32>
    %40 = vector.multi_reduction <add>, %39, %cst_27 [1] : vector<8x256xf32> to vector<8xf32>
    %41 = vector.shape_cast %40 : vector<8xf32> to vector<8x1xf32>
    %42 = arith.addf %38, %41 : vector<8x1xf32>
    %c0_28 = arith.constant 0 : index
    %c0_29 = arith.constant 0 : index
    %c0_30 = arith.constant 0 : index
    %43 = vector.load %arg7[%c0_28, %c0_29, %c0_30] : memref<2x8x1xf32, #tpu.memory_space<vmem>>, vector<1x8x1xf32>
    %44 = vector.shape_cast %43 : vector<1x8x1xf32> to vector<8x1xf32>
    %45 = vector.shape_cast %42 : vector<8x1xf32> to vector<1x8x1xf32>
    tpu.vector_store %arg7[%c0_28, %c0_29, %c0_30], %45 {strides = array<i32>} : memref<2x8x1xf32, #tpu.memory_space<vmem>>, vector<1x8x1xf32>,
    %c0_31 = arith.constant 0 : index
    %c0_32 = arith.constant 0 : index
    %c0_33 = arith.constant 0 : index
    %46 = vector.load %arg5[%c0_31, %c0_32, %c0_33] : memref<2x8x1xf32, #tpu.memory_space<vmem>>, vector<1x8x1xf32>
    %47 = vector.shape_cast %46 : vector<1x8x1xf32> to vector<8x1xf32>
    %48 = vector.shape_cast %21 : vector<8x1xf32> to vector<1x8x1xf32>
    tpu.vector_store %arg5[%c0_31, %c0_32, %c0_33], %48 {strides = array<i32>} : memref<2x8x1xf32, #tpu.memory_space<vmem>>, vector<1x8x1xf32>,
    %c1 = arith.constant 1 : index
    %c0_34 = arith.constant 0 : index
    %c0_35 = arith.constant 0 : index
    %49 = vector.load %arg2[%c1, %c0_34, %c0_35] : memref<2x4x256xf32, #tpu.memory_space<vmem>>, vector<1x4x256xf32>
    %50 = vector.shape_cast %49 : vector<1x4x256xf32> to vector<4x256xf32>
    %cst_36 = arith.constant dense<0.000000e+00> : vector<8x256xf32>
    %51 = tpu.matmul %3, %50, %cst_36 {dimension_numbers = #tpu.dot_dimension_numbers<[1], [0], [0], [1], [0, 0, 1, 1], [], []>} : vector<8x4xf32>, vector<4x256xf32>, vector<8x256xf32> -> vector<8x256xf32>
    %c1_37 = arith.constant 1 : index
    %c0_38 = arith.constant 0 : index
    %c0_39 = arith.constant 0 : index
    %52 = vector.load %arg8[%c1_37, %c0_38, %c0_39] : memref<2x8x1xf32, #tpu.memory_space<vmem>>, vector<1x8x1xf32>
    %53 = vector.shape_cast %52 : vector<1x8x1xf32> to vector<8x1xf32>
    %cst_40 = arith.constant dense<0.000000e+00> : vector<8xf32>
    %54 = vector.multi_reduction <add>, %51, %cst_40 [1] : vector<8x256xf32> to vector<8xf32>
    %55 = vector.shape_cast %54 : vector<8xf32> to vector<8x1xf32>
    %56 = arith.addf %53, %55 : vector<8x1xf32>
    %c1_41 = arith.constant 1 : index
    %c0_42 = arith.constant 0 : index
    %c0_43 = arith.constant 0 : index
    %57 = vector.load %arg8[%c1_41, %c0_42, %c0_43] : memref<2x8x1xf32, #tpu.memory_space<vmem>>, vector<1x8x1xf32>
    %58 = vector.shape_cast %57 : vector<1x8x1xf32> to vector<8x1xf32>
    %59 = vector.shape_cast %56 : vector<8x1xf32> to vector<1x8x1xf32>
    tpu.vector_store %arg8[%c1_41, %c0_42, %c0_43], %59 {strides = array<i32>} : memref<2x8x1xf32, #tpu.memory_space<vmem>>, vector<1x8x1xf32>,
    %cst_44 = arith.constant 1.000000e+00 : f32
    %60 = vector.broadcast %cst_44 : f32 to vector<8x256xf32>
    %61 = arith.mulf %51, %60 : vector<8x256xf32>
    %c1_45 = arith.constant 1 : index
    %c0_46 = arith.constant 0 : index
    %c0_47 = arith.constant 0 : index
    %62 = vector.load %arg5[%c1_45, %c0_46, %c0_47] : memref<2x8x1xf32, #tpu.memory_space<vmem>>, vector<1x8x1xf32>
    %63 = vector.shape_cast %62 : vector<1x8x1xf32> to vector<8x1xf32>
    %cst_48 = arith.constant dense<0xFF800000> : vector<8xf32>
    %64 = vector.multi_reduction <maximumf>, %61, %cst_48 [1] : vector<8x256xf32> to vector<8xf32>
    %65 = vector.shape_cast %64 : vector<8xf32> to vector<8x1xf32>
    %66 = arith.maximumf %63, %65 : vector<8x1xf32>
    %67 = arith.subf %63, %66 : vector<8x1xf32>
    %68 = math.exp %67 : vector<8x1xf32>
    %69 = vector.broadcast %66 : vector<8x1xf32> to vector<8x256xf32>
    %70 = arith.subf %61, %69 : vector<8x256xf32>
    %71 = math.exp %70 : vector<8x256xf32>
    %c1_49 = arith.constant 1 : index
    %c0_50 = arith.constant 0 : index
    %c0_51 = arith.constant 0 : index
    %72 = vector.load %arg6[%c1_49, %c0_50, %c0_51] : memref<2x8x1xf32, #tpu.memory_space<vmem>>, vector<1x8x1xf32>
    %73 = vector.shape_cast %72 : vector<1x8x1xf32> to vector<8x1xf32>
    %74 = arith.mulf %68, %73 : vector<8x1xf32>
    %cst_52 = arith.constant dense<0.000000e+00> : vector<8xf32>
    %75 = vector.multi_reduction <add>, %71, %cst_52 [1] : vector<8x256xf32> to vector<8xf32>
    %76 = vector.shape_cast %75 : vector<8xf32> to vector<8x1xf32>
    %77 = arith.addf %74, %76 : vector<8x1xf32>
    %c1_53 = arith.constant 1 : index
    %c0_54 = arith.constant 0 : index
    %c0_55 = arith.constant 0 : index
    %78 = vector.load %arg6[%c1_53, %c0_54, %c0_55] : memref<2x8x1xf32, #tpu.memory_space<vmem>>, vector<1x8x1xf32>
    %79 = vector.shape_cast %78 : vector<1x8x1xf32> to vector<8x1xf32>
    %80 = vector.shape_cast %77 : vector<8x1xf32> to vector<1x8x1xf32>
    tpu.vector_store %arg6[%c1_53, %c0_54, %c0_55], %80 {strides = array<i32>} : memref<2x8x1xf32, #tpu.memory_space<vmem>>, vector<1x8x1xf32>,
    %c1_56 = arith.constant 1 : index
    %c0_57 = arith.constant 0 : index
    %c0_58 = arith.constant 0 : index
    %81 = vector.load %arg7[%c1_56, %c0_57, %c0_58] : memref<2x8x1xf32, #tpu.memory_space<vmem>>, vector<1x8x1xf32>
    %82 = vector.shape_cast %81 : vector<1x8x1xf32> to vector<8x1xf32>
    %83 = arith.mulf %68, %82 : vector<8x1xf32>
    %84 = arith.mulf %51, %71 : vector<8x256xf32>
    %cst_59 = arith.constant dense<0.000000e+00> : vector<8xf32>
    %85 = vector.multi_reduction <add>, %84, %cst_59 [1] : vector<8x256xf32> to vector<8xf32>
    %86 = vector.shape_cast %85 : vector<8xf32> to vector<8x1xf32>
    %87 = arith.addf %83, %86 : vector<8x1xf32>
    %c1_60 = arith.constant 1 : index
    %c0_61 = arith.constant 0 : index
    %c0_62 = arith.constant 0 : index
    %88 = vector.load %arg7[%c1_60, %c0_61, %c0_62] : memref<2x8x1xf32, #tpu.memory_space<vmem>>, vector<1x8x1xf32>
    %89 = vector.shape_cast %88 : vector<1x8x1xf32> to vector<8x1xf32>
    %90 = vector.shape_cast %87 : vector<8x1xf32> to vector<1x8x1xf32>
    tpu.vector_store %arg7[%c1_60, %c0_61, %c0_62], %90 {strides = array<i32>} : memref<2x8x1xf32, #tpu.memory_space<vmem>>, vector<1x8x1xf32>,
    %c1_63 = arith.constant 1 : index
    %c0_64 = arith.constant 0 : index
    %c0_65 = arith.constant 0 : index
    %91 = vector.load %arg5[%c1_63, %c0_64, %c0_65] : memref<2x8x1xf32, #tpu.memory_space<vmem>>, vector<1x8x1xf32>
    %92 = vector.shape_cast %91 : vector<1x8x1xf32> to vector<8x1xf32>
    %93 = vector.shape_cast %66 : vector<8x1xf32> to vector<1x8x1xf32>
    tpu.vector_store %arg5[%c1_63, %c0_64, %c0_65], %93 {strides = array<i32>} : memref<2x8x1xf32, #tpu.memory_space<vmem>>, vector<1x8x1xf32>,
    %c0_i32_66 = arith.constant 0 : i32
    %94 = arith.cmpi eq, %arg1, %c0_i32_66 : i32
    %95 = arith.extui %94 : i1 to i32
    %c0_i32_67 = arith.constant 0 : i32
    %96 = arith.cmpi ne, %95, %c0_i32_67 : i32
    scf.if %96 {
      %c0_68 = arith.constant 0 : index
      %c0_69 = arith.constant 0 : index
      %c0_70 = arith.constant 0 : index
      %97 = vector.load %arg8[%c0_68, %c0_69, %c0_70] : memref<2x8x1xf32, #tpu.memory_space<vmem>>, vector<1x8x1xf32>
      %98 = vector.shape_cast %97 : vector<1x8x1xf32> to vector<8x1xf32>
      %cst_71 = arith.constant 3.906250e-03 : f32
      %99 = vector.broadcast %cst_71 : f32 to vector<8x1xf32>
      %100 = arith.mulf %98, %99 : vector<8x1xf32>
      %c0_72 = arith.constant 0 : index
      %c0_73 = arith.constant 0 : index
      %c0_74 = arith.constant 0 : index
      %101 = vector.load %arg7[%c0_72, %c0_73, %c0_74] : memref<2x8x1xf32, #tpu.memory_space<vmem>>, vector<1x8x1xf32>
      %102 = vector.shape_cast %101 : vector<1x8x1xf32> to vector<8x1xf32>
      %c0_75 = arith.constant 0 : index
      %c0_76 = arith.constant 0 : index
      %c0_77 = arith.constant 0 : index
      %103 = vector.load %arg6[%c0_75, %c0_76, %c0_77] : memref<2x8x1xf32, #tpu.memory_space<vmem>>, vector<1x8x1xf32>
      %104 = vector.shape_cast %103 : vector<1x8x1xf32> to vector<8x1xf32>
      %105 = tpu.reciprocal %104 : vector<8x1xf32> -> vector<8x1xf32>
      %106 = arith.mulf %102, %105 : vector<8x1xf32>
      %cst_78 = arith.constant 1.000000e-01 : f32
      %107 = vector.broadcast %cst_78 : f32 to vector<8x1xf32>
      %108 = arith.mulf %107, %106 : vector<8x1xf32>
      %109 = arith.addf %100, %108 : vector<8x1xf32>
      %c0_79 = arith.constant 0 : index
      %c0_80 = arith.constant 0 : index
      %c0_81 = arith.constant 0 : index
      %110 = vector.load %arg4[%c0_79, %c0_80, %c0_81] : memref<2x8x1xf32, #tpu.memory_space<vmem>>, vector<1x8x1xf32>
      %111 = vector.shape_cast %110 : vector<1x8x1xf32> to vector<8x1xf32>
      %112 = vector.shape_cast %109 : vector<8x1xf32> to vector<1x8x1xf32>
      tpu.vector_store %arg4[%c0_79, %c0_80, %c0_81], %112 {strides = array<i32>} : memref<2x8x1xf32, #tpu.memory_space<vmem>>, vector<1x8x1xf32>,
      %c1_82 = arith.constant 1 : index
      %c0_83 = arith.constant 0 : index
      %c0_84 = arith.constant 0 : index
      %113 = vector.load %arg8[%c1_82, %c0_83, %c0_84] : memref<2x8x1xf32, #tpu.memory_space<vmem>>, vector<1x8x1xf32>
      %114 = vector.shape_cast %113 : vector<1x8x1xf32> to vector<8x1xf32>
      %cst_85 = arith.constant 3.906250e-03 : f32
      %115 = vector.broadcast %cst_85 : f32 to vector<8x1xf32>
      %116 = arith.mulf %114, %115 : vector<8x1xf32>
      %c1_86 = arith.constant 1 : index
      %c0_87 = arith.constant 0 : index
      %c0_88 = arith.constant 0 : index
      %117 = vector.load %arg7[%c1_86, %c0_87, %c0_88] : memref<2x8x1xf32, #tpu.memory_space<vmem>>, vector<1x8x1xf32>
      %118 = vector.shape_cast %117 : vector<1x8x1xf32> to vector<8x1xf32>
      %c1_89 = arith.constant 1 : index
      %c0_90 = arith.constant 0 : index
      %c0_91 = arith.constant 0 : index
      %119 = vector.load %arg6[%c1_89, %c0_90, %c0_91] : memref<2x8x1xf32, #tpu.memory_space<vmem>>, vector<1x8x1xf32>
      %120 = vector.shape_cast %119 : vector<1x8x1xf32> to vector<8x1xf32>
      %121 = tpu.reciprocal %120 : vector<8x1xf32> -> vector<8x1xf32>
      %122 = arith.mulf %118, %121 : vector<8x1xf32>
      %cst_92 = arith.constant 1.000000e-01 : f32
      %123 = vector.broadcast %cst_92 : f32 to vector<8x1xf32>
      %124 = arith.mulf %123, %122 : vector<8x1xf32>
      %125 = arith.addf %116, %124 : vector<8x1xf32>
      %c1_93 = arith.constant 1 : index
      %c0_94 = arith.constant 0 : index
      %c0_95 = arith.constant 0 : index
      %126 = vector.load %arg4[%c1_93, %c0_94, %c0_95] : memref<2x8x1xf32, #tpu.memory_space<vmem>>, vector<1x8x1xf32>
      %127 = vector.shape_cast %126 : vector<1x8x1xf32> to vector<8x1xf32>
      %128 = vector.shape_cast %125 : vector<8x1xf32> to vector<1x8x1xf32>
      tpu.vector_store %arg4[%c1_93, %c0_94, %c0_95], %128 {strides = array<i32>} : memref<2x8x1xf32, #tpu.memory_space<vmem>>, vector<1x8x1xf32>,
    } else {
    }
    return
  }
  func.func @transform_0(%arg0: i32, %arg1: i32) -> (i32, i32, i32) {
    %c0_i32 = arith.constant 0 : i32
    %c0_i32_0 = arith.constant 0 : i32
    return %arg0, %c0_i32, %arg1 : i32, i32, i32
  }
  func.func @transform_1(%arg0: i32, %arg1: i32) -> (i32, i32) {
    %c0_i32 = arith.constant 0 : i32
    %c0_i32_0 = arith.constant 0 : i32
    %c0_i32_1 = arith.constant 0 : i32
    return %c0_i32, %c0_i32_0 : i32, i32
  }
  func.func @transform_2(%arg0: i32, %arg1: i32) -> (i32, i32, i32) {
    %c0_i32 = arith.constant 0 : i32
    %c0_i32_0 = arith.constant 0 : i32
    %c0_i32_1 = arith.constant 0 : i32
    return %arg0, %c0_i32, %c0_i32_0 : i32, i32, i32
  }
}

</mosaic_0001>

<bundles_post_ra>
// kernel: tpu_custom_call.1
= control target key start
LH: loop header
LB: loop body
LE: loop exit
PB: predicated region body
PF: predicated region fallthrough
CT: control target
= control target key end

     0   :  { %7 = vsyncpa [#allocation7], 0  ;;  %s532_s0 = inlined_call_operand.hbm [shape: f32[2,4,256], index: 0, kind: input, shape index: {}]   ;;  %s533_s1 = inlined_call_operand.hbm [shape: f32[8,4], index: 1, kind: input, shape index: {}]   ;;  %s534_s2 = inlined_call_operand.hbm [shape: f32[2,8,1], index: 2, kind: output, shape index: {}]  }
   0x1   :  { %8 = vsyncpa [#allocation10], 0 }
   0x2   :  { %9 = vsyncpa [#allocation8], 0  ;;  %s449_s9 = smov [#allocation6]   ;;  %s377_s13 = scalar_lea.hbm %s532_s0, 256 }
   0x3   :  { %s15_s10 = sshll.u32 %s449_s9, 4  ;;  %p378_p0 = scmp.ne.s32.totalorder %s532_s0, %s377_s13  ;;  %s16_s10 = int_to_ptr.vmem [resolvable:$true] %s15_s10 }
   0x4   :  { %p381_p1 = scmp.lt.u32.totalorder %s377_s13, %s532_s0 }
   0x6   :  { %p383_p2 = pnand %p381_p1, %p378_p0 }
   0x8   :  { %386 = shalt.err (!%p383_p2)
}
   0x9   :  { %s387_s18 = scalar_lea.vmem %s16_s10, 256  ;;  %p392_p4 = scmp.lt.s32.totalorder %s16_s10, %s16_s10 }
   0xa   :  { %p388_p3 = scmp.ne.s32.totalorder %s16_s10, %s387_s18  ;;  %p393_p5 = scmp.lt.s32.totalorder %s387_s18, %s387_s18 }
   0xc   :  { %p394_p6 = por %p393_p5, %p392_p4 }
   0xe   :  { %p395_p7 = pnand %p394_p6, %p388_p3 }
  0x10   :  { %398 = shalt.err (!%p395_p7)
}
  0x11   :  { %s450_s19 = smov 128   ;;  %s451_s20 = smov 8  }
  0x12   :  { %21 = dma.hbm_to_vmem [thread:$0]  %s532_s0, 256, %s16_s10, [#allocation7], %s450_s19, %s450_s19, %s451_s20  }
  0x13   :  { %s452_s23 = smov [#allocation9]   ;;  %s399_s27 = scalar_lea.hbm %s533_s1, 128 }
  0x14   :  { %s28_s24 = sshll.u32 %s452_s23, 4  ;;  %p400_p8 = scmp.ne.s32.totalorder %s533_s1, %s399_s27  ;;  %s29_s24 = int_to_ptr.vmem [resolvable:$true] %s28_s24 }
  0x15   :  { %p403_p9 = scmp.lt.u32.totalorder %s399_s27, %s533_s1 }
  0x17   :  { %p405_p10 = pnand %p403_p9, %p400_p8 }
  0x19   :  { %408 = shalt.err (!%p405_p10)
}
  0x1a   :  { %s409_s4 = scalar_lea.vmem %s29_s24, 128  ;;  %p414_p12 = scmp.lt.s32.totalorder %s29_s24, %s29_s24 }
  0x1b   :  { %p410_p11 = scmp.ne.s32.totalorder %s29_s24, %s409_s4  ;;  %p415_p13 = scmp.lt.s32.totalorder %s409_s4, %s409_s4 }
  0x1d   :  { %p416_p0 = por %p415_p13, %p414_p12 }
  0x1f   :  { %p417_p1 = pnand %p416_p0, %p410_p11 }
  0x21   :  { %420 = shalt.err (!%p417_p1)
}
  0x22   :  { %31 = dma.hbm_to_vmem [thread:$0]  %s533_s1, 128, %s29_s24, [#allocation10]  }
  0x23   :  { %443 = dma.done.wait [#allocation7], 256  }
  0x24   :  { %444 = vsyncadd [#allocation7], 4294967040 }
  0x25   :  { %445 = dma.done.wait [#allocation10], 128  }
  0x26   :  { %446 = vsyncadd [#allocation10], 4294967168  ;;  %v453_v0 = vmov 0.0   ;;  %v52_v1 = vld [vmem:[#allocation6] sm:$0xff]  ;;  %vm59_vm0 = vcmask 1043456   ;;  %v179_v2 = vld [vmem:[#allocation6 + $0x8] sm:$0xff] }
  0x27   :  { %128 = vmatprep.mubr.f32.mxu0 %v453_v0  ;;  %250 = vmatprep.mubr.f32.mxu1 %v453_v0  ;;  %v54_v3 = vcombine.high %v52_v1, %v52_v1  ;;  %v181_v4 = vcombine.high %v179_v2, %v179_v2  ;;  %v51_v5 = vld [vmem:[#allocation9] sm:$0xff]  ;;  %vm55_vm1 = vcmask 31744   ;;  %vm42_vm2 = vcmask 7168   ;;  %s456_s1 = smov [#allocation11]  }
  0x28   :  { %v454_v6 = vmov -inf   ;;  %45 = vst.msk [vmem:[#allocation3] sm:$0xff] %vm42_vm2, %v453_v0  ;;  %46 = vst.msk [vmem:[#allocation3 + $0x8] sm:$0xff] %vm42_vm2, %v453_v0  ;;  %v455_v15 = vmov 0   ;;  %s330_s6 = sshll.u32 %s456_s1, 4  ;;  %s331_s6 = int_to_ptr.vmem [resolvable:$true] %s330_s6 }
  0x29   :  { %343 = vmatprep.subr.msk.mxu0 %vm59_vm0, %v54_v3  ;;  %346 = vmatprep.subr.msk.mxu1 %vm59_vm0, %v181_v4  ;;  %43 = vst.msk [vmem:[#allocation2] sm:$0xff] %vm42_vm2, %v454_v6  ;;  %44 = vst.msk [vmem:[#allocation2 + $0x8] sm:$0xff] %vm42_vm2, %v454_v6  ;;  %s421_s7 = scalar_lea.vmem %s331_s6, 256  ;;  %p426_p3 = scmp.lt.s32.totalorder %s331_s6, %s331_s6 }
  0x2a   :  { %344 = vmatpush1.msk.msra.mxu0 %vm59_vm0, %v52_v1  ;;  %347 = vmatpush1.msk.msra.mxu1 %vm59_vm0, %v179_v2  ;;  %47 = vst.msk [vmem:[#allocation4] sm:$0xff] %vm42_vm2, %v453_v0  ;;  %48 = vst.msk [vmem:[#allocation4 + $0x8] sm:$0xff] %vm42_vm2, %v453_v0  ;;  %p422_p2 = scmp.ne.s32.totalorder %s331_s6, %s421_s7  ;;  %p427_p4 = scmp.lt.s32.totalorder %s421_s7, %s421_s7 }
  0x2b   :  { %345 = vmatmul.mubr.msk.f32.vlgmr.msra.gmra.mrb[0].mxu0 %vm55_vm1, %v51_v5  ;;  %348 = vmatmul.mubr.msk.f32.vlgmr.msra.gmra.mrb[0].mxu1 %vm55_vm1, %v51_v5  ;;  %49 = vst.msk [vmem:[#allocation5] sm:$0xff] %vm42_vm2, %v453_v0  ;;  %50 = vst.msk [vmem:[#allocation5 + $0x8] sm:$0xff] %vm42_vm2, %v453_v0 }
  0x2c   :  { %357 = vset.pattern.permute.xlu1 %v455_v15  ;;  %358 = vset.pattern.permute.xlu0 %v455_v15  ;;  %p428_p5 = por %p427_p4, %p426_p3 }
  0x2e   :  { %p429_p6 = pnand %p428_p5, %p422_p2 }
  0x2f   :  { %v161_v49 = vld [vmem:[#allocation3] sm:$0xff]  ;;  %v285_v53 = vld [vmem:[#allocation3 + $0x8] sm:$0xff] }
  0x30   :  { %v142_v16 = vld [vmem:[#allocation2] sm:$0xff]  ;;  %v265_v19 = vld [vmem:[#allocation2 + $0x8] sm:$0xff] }
  0x31   :  { %v168_v59 = vld [vmem:[#allocation4] sm:$0xff]  ;;  %v293_v0 = vld [vmem:[#allocation4 + $0x8] sm:$0xff] }
  0x32   :  { %v135_v55 = vld [vmem:[#allocation5] sm:$0xff]  ;;  %v258_v6 = vld [vmem:[#allocation5 + $0x8] sm:$0xff] }
  0xfe   :  { %v130_v7 = vpop.f32.mrb[0].mxu0  ;;  %v252_v8 = vpop.f32.mrb[0].mxu1 }
  0xff   :  { %v132_v9 = vpop.f32.mrb[1].mxu0  ;;  %v254_v10 = vpop.f32.mrb[1].mxu1 }
 0x100   :  { %v143_v11 = vmax.f32 %v130_v7, %v132_v9  ;;  %v266_v12 = vmax.f32 %v252_v8, %v254_v10  ;;  %v136_v13 = vadd.f32 %v132_v9, %v130_v7  ;;  %v259_v14 = vadd.f32 %v254_v10, %v252_v8 }
 0x102   :  { %144 = vmax.xlane.f32.xlu0 %v143_v11 }
 0x106   :  { %267 = vmax.xlane.f32.xlu0 %v266_v12 }
 0x18f   :  { %v145_v17 = vpop.xlane.xlu0 %144 }
 0x190   :  { %v146_v18 = vmax.f32 %v142_v16, %v145_v17 }
 0x192   :  { %v147_v20 = vsub.f32 %v142_v16, %v146_v18  ;;  %177 = vst.msk [vmem:[#allocation2] sm:$0xff] %vm42_vm2, %v146_v18  ;;  %152 = vperm.xlu1 %357, %v146_v18  }
 0x193   :  { %v268_v21 = vpop.xlane.xlu0 %267 }
 0x194   :  { %v269_v22 = vmax.f32 %v265_v19, %v268_v21  ;;  %v148_v46 = vmul.f32 1.442695, %v147_v20 }
 0x196   :  { %v270_v23 = vsub.f32 %v265_v19, %v269_v22  ;;  %302 = vst.msk [vmem:[#allocation2 + $0x8] sm:$0xff] %vm42_vm2, %v269_v22  ;;  %275 = vperm.xlu1 %357, %v269_v22  }
 0x198   :  { %v271_v47 = vmul.f32 1.442695, %v270_v23 }
 0x211   :  { %v153_v24 = vpop.permute.xlu1 %152 }
 0x212   :  { %v155_v25 = vsub.f32 %v130_v7, %v153_v24  ;;  %v156_v26 = vsub.f32 %v132_v9, %v153_v24 }
 0x214   :  { %v157_v27 = vmul.f32 1.442695, %v155_v25  ;;  %v159_v28 = vmul.f32 1.442695, %v156_v26 }
 0x215   :  { %v276_v29 = vpop.permute.xlu1 %275 }
 0x216   :  { %361 = vpow2.f32 %v157_v27  ;;  %v278_v30 = vsub.f32 %v252_v8, %v276_v29  ;;  %v279_v31 = vsub.f32 %v254_v10, %v276_v29 }
 0x217   :  { %363 = vpow2.f32 %v159_v28 }
 0x218   :  { %v280_v32 = vmul.f32 1.442695, %v278_v30  ;;  %v282_v33 = vmul.f32 1.442695, %v279_v31 }
 0x21a   :  { %365 = vpow2.f32 %v280_v32 }
 0x21b   :  { %367 = vpow2.f32 %v282_v33 }
 0x21c   :  { %369 = vpow2.f32 %v148_v46 }
 0x21d   :  { %371 = vpow2.f32 %v271_v47 }
 0x220   :  { %v362_v34 = vpop.eup %361 }
 0x221   :  { %v364_v35 = vpop.eup %363  ;;  %v170_v36 = vmul.f32 %v362_v34, %v130_v7 }
 0x222   :  { %v163_v37 = vadd.f32 %v364_v35, %v362_v34  ;;  %v171_v38 = vmul.f32 %v364_v35, %v132_v9 }
 0x224   :  { %v366_v39 = vpop.eup %365  ;;  %164 = vadd.xlane.f32.xlu0 %v163_v37  ;;  %v172_v40 = vadd.f32 %v171_v38, %v170_v36 }
 0x225   :  { %v368_v41 = vpop.eup %367  ;;  %v295_v42 = vmul.f32 %v366_v39, %v252_v8 }
 0x226   :  { %v287_v43 = vadd.f32 %v368_v41, %v366_v39  ;;  %v296_v44 = vmul.f32 %v368_v41, %v254_v10  ;;  %v370_v48 = vpop.eup %369 }
 0x227   :  { %v162_v50 = vmul.f32 %v370_v48, %v161_v49  ;;  %v372_v51 = vpop.eup %371  ;;  %v169_v62 = vmul.f32 %v370_v48, %v168_v59 }
 0x228   :  { %137 = vadd.xlane.f32.xlu0 %v136_v13  ;;  %288 = vadd.xlane.f32.xlu1 %v287_v43  ;;  %v297_v45 = vadd.f32 %v296_v44, %v295_v42  ;;  %v286_v56 = vmul.f32 %v372_v51, %v285_v53  ;;  %v294_v3 = vmul.f32 %v372_v51, %v293_v0 }
 0x22c   :  { %173 = vadd.xlane.f32.xlu0 %v172_v40 }
 0x230   :  { %298 = vadd.xlane.f32.xlu0 %v297_v45 }
 0x234   :  { %260 = vadd.xlane.f32.xlu0 %v259_v14 }
 0x2b1   :  { %v165_v52 = vpop.xlane.xlu0 %164 }
 0x2b2   :  { %v166_v54 = vadd.f32 %v165_v52, %v162_v50 }
 0x2b4   :  { %167 = vst.msk [vmem:[#allocation3] sm:$0xff] %vm42_vm2, %v166_v54 }
 0x2b5   :  { %v138_v57 = vpop.xlane.xlu0 %137  ;;  %v289_v58 = vpop.xlane.xlu1 %288 }
 0x2b6   :  { %v139_v60 = vadd.f32 %v138_v57, %v135_v55  ;;  %v290_v61 = vadd.f32 %v289_v58, %v286_v56 }
 0x2b8   :  { %141 = vst.msk [vmem:[#allocation5] sm:$0xff] %vm42_vm2, %v139_v60  ;;  %291 = vst.msk [vmem:[#allocation3 + $0x8] sm:$0xff] %vm42_vm2, %v290_v61 }
 0x2b9   :  { %v174_v63 = vpop.xlane.xlu0 %173 }
 0x2ba   :  { %v175_v1 = vadd.f32 %v174_v63, %v169_v62 }
 0x2bb   :  { %v309_v2 = vld [vmem:[#allocation3] sm:$0xff] }
 0x2bc   :  { %176 = vst.msk [vmem:[#allocation4] sm:$0xff] %vm42_vm2, %v175_v1  ;;  %373 = vrcp.f32 %v309_v2 }
 0x2bd   :  { %v299_v4 = vpop.xlane.xlu0 %298 }
 0x2be   :  { %v300_v5 = vadd.f32 %v299_v4, %v294_v3 }
 0x2bf   :  { %v318_v7 = vld [vmem:[#allocation3 + $0x8] sm:$0xff]  ;;  %v306_v11 = vld [vmem:[#allocation5] sm:$0xff] }
 0x2c0   :  { %301 = vst.msk [vmem:[#allocation4 + $0x8] sm:$0xff] %vm42_vm2, %v300_v5  ;;  %375 = vrcp.f32 %v318_v7  ;;  %v307_v14 = vmul.f32 0.00390625, %v306_v11 }
 0x2c1   :  { %v261_v8 = vpop.xlane.xlu0 %260 }
 0x2c2   :  { %v262_v9 = vadd.f32 %v261_v8, %v258_v6 }
 0x2c3   :  { %v308_v12 = vld [vmem:[#allocation4] sm:$0xff] }
 0x2c4   :  { %263 = vst.msk [vmem:[#allocation5 + $0x8] sm:$0xff] %vm42_vm2, %v262_v9 }
 0x2c6   :  { %v374_v10 = vpop.eup %373 }
 0x2c7   :  { %v311_v13 = vmul.f32 %v374_v10, %v308_v12  ;;  %v317_v17 = vld [vmem:[#allocation4 + $0x8] sm:$0xff] }
 0x2c9   :  { %v312_v15 = vmul.f32 0.1, %v311_v13 }
 0x2ca   :  { %v376_v16 = vpop.eup %375 }
 0x2cb   :  { %v313_v18 = vadd.f32 %v312_v15, %v307_v14  ;;  %v315_v19 = vld [vmem:[#allocation5 + $0x8] sm:$0xff]  ;;  %v320_v20 = vmul.f32 %v376_v16, %v317_v17 }
 0x2cc   :  { %v316_v21 = vmul.f32 0.00390625, %v315_v19 }
 0x2cd   :  { %314 = vst.msk [vmem:[#allocation11] sm:$0xff] %vm42_vm2, %v313_v18  ;;  %v321_v22 = vmul.f32 0.1, %v320_v20 }
 0x2cf   :  { %v322_v23 = vadd.f32 %v321_v22, %v316_v21 }
 0x2d1   :  { %324 = vst.msk [vmem:[#allocation11 + $0x8] sm:$0xff] %vm42_vm2, %v322_v23 }
 0x2d2   :  { %432 = shalt.err (!%p429_p6)
}
 0x2d3   :  { %s433_s10 = scalar_lea.hbm %s534_s2, 256 }
 0x2d4   :  { %p434_p7 = scmp.ne.s32.totalorder %s534_s2, %s433_s10  ;;  %p437_p8 = scmp.lt.u32.totalorder %s433_s10, %s534_s2 }
 0x2d6   :  { %p439_p9 = pnand %p437_p8, %p434_p7 }
 0x2d8   :  { %442 = shalt.err (!%p439_p9)
}
 0x2d9   :  { %336 = dma.vmem_to_hbm [thread:$0]  %s331_s6, 256, %s534_s2, [#allocation8], %s450_s19, %s450_s19, %s451_s20  }
 0x2da   :  { %447 = dma.done.wait [#allocation8], 256  }
 0x2db   :  { %448 = vsyncadd [#allocation8], 4294967040 }
 0x2dc   :  { %340 = vsyncpa [#allocation7], 1 }
 0x2dd   :  { %341 = vsyncpa [#allocation10], 1 }
 0x2de   :  { %342 = vsyncpa [#allocation8], 1 }

</bundles_post_ra>
